<compile_context>
chip_gen: v7x
topology: tpu7x:2x2x1
jax: 0.10.0
libtpu: 0.0.40
codegen_flags: <defaults>
</compile_context>

<pallas_src>
import functools

import jax
import jax.numpy as jnp
from jax.experimental import pallas as pl
from jax.experimental.pallas import tpu as pltpu


def _masked_ce_kernel(len_ref,      # SMEM: (B,) int32   (scalar prefetch)
                      logits_ref,   # VMEM in : (1, C, tile_t)
                      tgt_ref,      # VMEM in : (1, 1, tile_t) int32
                      num_ref,      # VMEM out: (1, 1, tile_t) f32  (per-b masked-loss partials)
                      den_ref):     # VMEM out: (1, 1, tile_t) f32  (per-b mask-count partials)
    b = pl.program_id(0)
    t = pl.program_id(1)

    @pl.when(t == 0)
    def _():
        num_ref[...] = jnp.zeros_like(num_ref)
        den_ref[...] = jnp.zeros_like(den_ref)

    logits = logits_ref[0].astype(jnp.float32)       # (C, tile_t), class on sublanes
    tgt = tgt_ref[0]                                 # (1, tile_t) int32
    C, tile_t = logits.shape

    # log-softmax over the class (sublane) axis.
    m = jnp.max(logits, axis=0, keepdims=True)                                # (1, tile_t)
    lse = jnp.log(jnp.sum(jnp.exp(logits - m), axis=0, keepdims=True)) + m    # (1, tile_t)

    # "Gather" logits[target[t], t] via iota/compare/select (no real gather needed).
    cls = jax.lax.broadcasted_iota(jnp.int32, (C, tile_t), 0)
    picked = jnp.sum(jnp.where(cls == tgt, logits, 0.0), axis=0, keepdims=True)

    losses = lse - picked                                                     # (1, tile_t)

    # Sequence mask built in-kernel from prefetched lengths.  Since lengths <= T, this
    # also zeroes any garbage lanes of a ragged (padded) final time tile.
    t_idx = t * tile_t + jax.lax.broadcasted_iota(jnp.int32, (1, tile_t), 1)
    valid = t_idx < len_ref[b]                                                # (1, tile_t) bool

    num_ref[...] += jnp.where(valid, losses, 0.0)[None]                       # (1, 1, tile_t)
    den_ref[...] += valid.astype(jnp.float32)[None]


def _choose_tile_t(T, C, itemsize, target_bytes=2 << 20, max_tile=4096):
    """Time-tile: full T when the whole row fits the budget, else a multiple of 128."""
    if T <= 128 or (T <= max_tile and itemsize * C * T <= target_bytes):
        return int(T)
    cand = (target_bytes // max(1, itemsize * C)) // 128 * 128
    cand = max(128, min(cand, max_tile))
    return int(min(cand, (T // 128) * 128))


def sequence_mask(lengths, max_len):
    # JAX equivalent of the PyTorch helper: (B, max_len) float mask, 1.0 where t < length.
    seq_range = jnp.arange(max_len, dtype=jnp.int32)
    return (seq_range[None, :] < lengths[:, None].astype(jnp.int32)).astype(jnp.float32)


@functools.partial(jax.jit, static_argnames=("max_len", "tile_t"))
def masked_cross_entropy_loss(input_nc, target, lengths, max_len=None, tile_t=None):
    """input_nc: (B, C, T, 1) logits (f32/bf16); target: (B, T, 1) int ids; lengths: (B,) int.

    Returns the scalar masked cross-entropy, identical to the PyTorch module's forward
    when called with `lengths` (mask derived as t < lengths[b]).
    """
    # TODO(synk): the original forward also accepts an arbitrary precomputed `mask`
    # tensor; only the lengths-based prefix mask is implemented in-kernel here.
    B, C, T, _ = input_nc.shape
    if max_len is None:
        max_len = T
    assert max_len == T, "target is defined over T steps; max_len must equal T"

    logits = input_nc[..., 0]                          # (B, C, T) -- free squeeze, no transpose
    tgt = target.reshape(B, 1, T).astype(jnp.int32)    # (B, 1, T) -- free reshape
    lens = lengths.astype(jnp.int32)                   # (B,)      -- scalar-prefetched

    if tile_t is None:
        tile_t = _choose_tile_t(T, C, jnp.dtype(input_nc.dtype).itemsize)
    nt = pl.cdiv(T, tile_t)

    num_out, den_out = pl.pallas_call(
        _masked_ce_kernel,
        out_shape=(
            jax.ShapeDtypeStruct((B, 1, tile_t), jnp.float32),   # per-b masked-loss partials
            jax.ShapeDtypeStruct((B, 1, tile_t), jnp.float32),   # per-b mask-count partials
        ),
        grid_spec=pltpu.PrefetchScalarGridSpec(
            num_scalar_prefetch=1,
            grid=(B, nt),
            in_specs=[
                pl.BlockSpec((1, C, tile_t), lambda b, t, lens: (b, 0, t)),
                pl.BlockSpec((1, 1, tile_t), lambda b, t, lens: (b, 0, t)),
            ],
            out_specs=(
                pl.BlockSpec((1, 1, tile_t), lambda b, t, lens: (b, 0, 0)),
                pl.BlockSpec((1, 1, tile_t), lambda b, t, lens: (b, 0, 0)),
            ),
        ),
        compiler_params=pltpu.CompilerParams(
            dimension_semantics=("parallel", "arbitrary")),
    )(lens, logits, tgt)

    # Tiny XLA epilogue: reduce the per-row lane partials (same semantics as PyTorch).
    return jnp.sum(num_out) / jnp.sum(den_out)


def _reference_loss(input_nc, target, lengths, max_len=None):
    # Pure-JAX reference mirroring the PyTorch forward exactly.
    B, C, T, _ = input_nc.shape
    if max_len is None:
        max_len = T
    mask = sequence_mask(lengths, max_len)[..., None]                        # (B, T, 1)
    logits = jnp.transpose(input_nc[..., 0], (0, 2, 1)).astype(jnp.float32)  # (B, T, C)
    logp = jax.nn.log_softmax(logits, axis=-1)
    losses = -jnp.take_along_axis(logp, target.astype(jnp.int32), axis=-1)   # (B, T, 1)
    return jnp.sum(losses * mask) / jnp.sum(mask)


if __name__ == "__main__":
    key = jax.random.PRNGKey(0)
    k1, k2, k3, k4 = jax.random.split(key, 4)

    # --- small single-tile test ---
    B, C, T = 2, 32, 16
    input_nc = jax.random.normal(k1, (B, C, T, 1), dtype=jnp.float32)   # NCHW-style logits
    target = jax.random.randint(k2, (B, T, 1), 0, C, dtype=jnp.int32)   # class indices
    lengths = jnp.array([T, 9], dtype=jnp.int32)                        # valid lengths per row

    loss = jax.block_until_ready(masked_cross_entropy_loss(input_nc, target, lengths))
    ref = _reference_loss(input_nc, target, lengths)
    assert jnp.allclose(loss, ref, rtol=1e-5, atol=1e-5), (loss, ref)

    # --- multi-tile test: pipelined T tiles, ragged last tile, per-row masking ---
    B2, C2, T2 = 2, 32, 640
    input_nc2 = jax.random.normal(k3, (B2, C2, T2, 1), dtype=jnp.float32)
    target2 = jax.random.randint(k4, (B2, T2, 1), 0, C2, dtype=jnp.int32)
    lengths2 = jnp.array([T2, 300], dtype=jnp.int32)

    loss2 = jax.block_until_ready(
        masked_cross_entropy_loss(input_nc2, target2, lengths2, tile_t=256))
    ref2 = _reference_loss(input_nc2, target2, lengths2)
    assert jnp.allclose(loss2, ref2, rtol=1e-4, atol=1e-5), (loss2, ref2)

    print("KERNEL_OK")
</pallas_src>

<mosaic_0001>
module attributes {stable_mosaic.version = 11 : i64} {
  func.func @_masked_ce_kernel(%arg0: i32, %arg1: i32, %arg2: memref<2xi32, #tpu.memory_space<smem>>, %arg3: memref<1x32x16xf32, #tpu.memory_space<vmem>>, %arg4: memref<1x1x16xi32, #tpu.memory_space<vmem>>, %arg5: memref<1x1x16xf32, #tpu.memory_space<vmem>>, %arg6: memref<1x1x16xf32, #tpu.memory_space<vmem>>) attributes {dimension_semantics = [#tpu.dimension_semantics<parallel>, #tpu.dimension_semantics<arbitrary>], iteration_bounds = array<i64: 2, 1>, scalar_prefetch = 1 : i64, scratch_operands = 0 : i64, tpu.core_type = #tpu.core_type<tc>, window_params = [{transform_indices = @transform_0, window_bounds = array<i64: 1, 32, 16>}, {transform_indices = @transform_1, window_bounds = array<i64: 1, 1, 16>}, {transform_indices = @transform_2, window_bounds = array<i64: 1, 1, 16>}, {transform_indices = @transform_3, window_bounds = array<i64: 1, 1, 16>}]} {
    %c0_i32 = arith.constant 0 : i32
    %0 = arith.cmpi eq, %arg1, %c0_i32 : i32
    %1 = arith.extui %0 : i1 to i32
    %c0_i32_0 = arith.constant 0 : i32
    %2 = arith.cmpi ne, %1, %c0_i32_0 : i32
    scf.if %2 {
      %cst_22 = arith.constant 0.000000e+00 : f32
      %44 = vector.broadcast %cst_22 : f32 to vector<1x1x16xf32>
      %c0_23 = arith.constant 0 : index
      %c0_24 = arith.constant 0 : index
      %c0_25 = arith.constant 0 : index
      %45 = vector.load %arg5[%c0_23, %c0_24, %c0_25] : memref<1x1x16xf32, #tpu.memory_space<vmem>>, vector<1x1x16xf32>
      tpu.vector_store %arg5[%c0_23, %c0_24, %c0_25], %44 {strides = array<i32>} : memref<1x1x16xf32, #tpu.memory_space<vmem>>, vector<1x1x16xf32>,
      %cst_26 = arith.constant 0.000000e+00 : f32
      %46 = vector.broadcast %cst_26 : f32 to vector<1x1x16xf32>
      %c0_27 = arith.constant 0 : index
      %c0_28 = arith.constant 0 : index
      %c0_29 = arith.constant 0 : index
      %47 = vector.load %arg6[%c0_27, %c0_28, %c0_29] : memref<1x1x16xf32, #tpu.memory_space<vmem>>, vector<1x1x16xf32>
      tpu.vector_store %arg6[%c0_27, %c0_28, %c0_29], %46 {strides = array<i32>} : memref<1x1x16xf32, #tpu.memory_space<vmem>>, vector<1x1x16xf32>,
    } else {
    }
    %c0 = arith.constant 0 : index
    %c0_1 = arith.constant 0 : index
    %c0_2 = arith.constant 0 : index
    %3 = vector.load %arg3[%c0, %c0_1, %c0_2] : memref<1x32x16xf32, #tpu.memory_space<vmem>>, vector<1x32x16xf32>
    %4 = vector.shape_cast %3 : vector<1x32x16xf32> to vector<32x16xf32>
    %c0_3 = arith.constant 0 : index
    %c0_4 = arith.constant 0 : index
    %c0_5 = arith.constant 0 : index
    %5 = vector.load %arg4[%c0_3, %c0_4, %c0_5] : memref<1x1x16xi32, #tpu.memory_space<vmem>>, vector<1x1x16xi32>
    %6 = vector.shape_cast %5 : vector<1x1x16xi32> to vector<1x16xi32>
    %cst = arith.constant dense<0xFF800000> : vector<16xf32>
    %7 = vector.multi_reduction <maximumf>, %4, %cst [0] : vector<32x16xf32> to vector<16xf32>
    %8 = vector.shape_cast %7 : vector<16xf32> to vector<1x16xf32>
    %9 = vector.broadcast %8 : vector<1x16xf32> to vector<32x16xf32>
    %10 = arith.subf %4, %9 : vector<32x16xf32>
    %11 = math.exp %10 : vector<32x16xf32>
    %cst_6 = arith.constant dense<0.000000e+00> : vector<16xf32>
    %12 = vector.multi_reduction <add>, %11, %cst_6 [0] : vector<32x16xf32> to vector<16xf32>
    %13 = vector.shape_cast %12 : vector<16xf32> to vector<1x16xf32>
    %14 = math.log %13 : vector<1x16xf32>
    %15 = arith.addf %14, %8 : vector<1x16xf32>
    %16 = tpu.iota {dimensions = array<i32: 0>} : vector<32x16xi32>
    %17 = vector.broadcast %6 : vector<1x16xi32> to vector<32x16xi32>
    %18 = arith.cmpi eq, %16, %17 : vector<32x16xi32>
    %cst_7 = arith.constant 0.000000e+00 : f32
    %19 = vector.broadcast %cst_7 : f32 to vector<32x16xf32>
    %20 = arith.select %18, %4, %19 : vector<32x16xi1>, vector<32x16xf32>
    %cst_8 = arith.constant dense<0.000000e+00> : vector<16xf32>
    %21 = vector.multi_reduction <add>, %20, %cst_8 [0] : vector<32x16xf32> to vector<16xf32>
    %22 = vector.shape_cast %21 : vector<16xf32> to vector<1x16xf32>
    %23 = arith.subf %15, %22 : vector<1x16xf32>
    %c16_i32 = arith.constant 16 : i32
    %24 = arith.muli %arg1, %c16_i32 : i32
    %25 = tpu.iota {dimensions = array<i32: 1>} : vector<1x16xi32>
    %26 = vector.broadcast %24 : i32 to vector<1x16xi32>
    %27 = arith.addi %26, %25 : vector<1x16xi32>
    %28 = arith.index_cast %arg0 : i32 to index
    %29 = memref.load %arg2[%28] : memref<2xi32, #tpu.memory_space<smem>>
    %30 = vector.broadcast %29 : i32 to vector<1x16xi32>
    %31 = arith.cmpi slt, %27, %30 : vector<1x16xi32>
    %c0_9 = arith.constant 0 : index
    %c0_10 = arith.constant 0 : index
    %c0_11 = arith.constant 0 : index
    %32 = vector.load %arg5[%c0_9, %c0_10, %c0_11] : memref<1x1x16xf32, #tpu.memory_space<vmem>>, vector<1x1x16xf32>
    %cst_12 = arith.constant 0.000000e+00 : f32
    %33 = vector.broadcast %cst_12 : f32 to vector<1x16xf32>
    %34 = arith.select %31, %23, %33 : vector<1x16xi1>, vector<1x16xf32>
    %35 = vector.shape_cast %34 : vector<1x16xf32> to vector<1x1x16xf32>
    %36 = arith.addf %32, %35 : vector<1x1x16xf32>
    %c0_13 = arith.constant 0 : index
    %c0_14 = arith.constant 0 : index
    %c0_15 = arith.constant 0 : index
    %37 = vector.load %arg5[%c0_13, %c0_14, %c0_15] : memref<1x1x16xf32, #tpu.memory_space<vmem>>, vector<1x1x16xf32>
    tpu.vector_store %arg5[%c0_13, %c0_14, %c0_15], %36 {strides = array<i32>} : memref<1x1x16xf32, #tpu.memory_space<vmem>>, vector<1x1x16xf32>,
    %c0_16 = arith.constant 0 : index
    %c0_17 = arith.constant 0 : index
    %c0_18 = arith.constant 0 : index
    %38 = vector.load %arg6[%c0_16, %c0_17, %c0_18] : memref<1x1x16xf32, #tpu.memory_space<vmem>>, vector<1x1x16xf32>
    %39 = arith.extui %31 : vector<1x16xi1> to vector<1x16xi32>
    %40 = arith.sitofp %39 : vector<1x16xi32> to vector<1x16xf32>
    %41 = vector.shape_cast %40 : vector<1x16xf32> to vector<1x1x16xf32>
    %42 = arith.addf %38, %41 : vector<1x1x16xf32>
    %c0_19 = arith.constant 0 : index
    %c0_20 = arith.constant 0 : index
    %c0_21 = arith.constant 0 : index
    %43 = vector.load %arg6[%c0_19, %c0_20, %c0_21] : memref<1x1x16xf32, #tpu.memory_space<vmem>>, vector<1x1x16xf32>
    tpu.vector_store %arg6[%c0_19, %c0_20, %c0_21], %42 {strides = array<i32>} : memref<1x1x16xf32, #tpu.memory_space<vmem>>, vector<1x1x16xf32>,
    return
  }
  func.func @transform_0(%arg0: i32, %arg1: i32, %arg2: memref<2xi32, #tpu.memory_space<smem>>) -> (i32, i32, i32) {
    %c0_i32 = arith.constant 0 : i32
    %c0_i32_0 = arith.constant 0 : i32
    return %arg0, %c0_i32, %arg1 : i32, i32, i32
  }
  func.func @transform_1(%arg0: i32, %arg1: i32, %arg2: memref<2xi32, #tpu.memory_space<smem>>) -> (i32, i32, i32) {
    %c0_i32 = arith.constant 0 : i32
    %c0_i32_0 = arith.constant 0 : i32
    return %arg0, %c0_i32, %arg1 : i32, i32, i32
  }
  func.func @transform_2(%arg0: i32, %arg1: i32, %arg2: memref<2xi32, #tpu.memory_space<smem>>) -> (i32, i32, i32) {
    %c0_i32 = arith.constant 0 : i32
    %c0_i32_0 = arith.constant 0 : i32
    %c0_i32_1 = arith.constant 0 : i32
    return %arg0, %c0_i32, %c0_i32_0 : i32, i32, i32
  }
  func.func @transform_3(%arg0: i32, %arg1: i32, %arg2: memref<2xi32, #tpu.memory_space<smem>>) -> (i32, i32, i32) {
    %c0_i32 = arith.constant 0 : i32
    %c0_i32_0 = arith.constant 0 : i32
    %c0_i32_1 = arith.constant 0 : i32
    return %arg0, %c0_i32, %c0_i32_0 : i32, i32, i32
  }
}

</mosaic_0001>

<bundles_post_ra>
// kernel: masked_cross_entropy_loss.1
= control target key start
LH: loop header
LB: loop body
LE: loop exit
PB: predicated region body
PF: predicated region fallthrough
CT: control target
= control target key end

     0   :  { %s622_s0 = inlined_call_operand.vmem [shape: s32[2], index: 0, kind: input, shape index: {}]   ;;  %s623_s1 = inlined_call_operand.vmem [shape: f32[2,32,16], index: 1, kind: input, shape index: {}]   ;;  %s624_s2 = inlined_call_operand.vmem [shape: s32[2,1,16], index: 2, kind: input, shape index: {}]   ;;  %s625_s3 = inlined_call_operand.vmem [shape: f32[2,1,16], index: 3, kind: output, shape index: {0}]   ;;  %s626_s4 = inlined_call_operand.vmem [shape: f32[2,1,16], index: 4, kind: output, shape index: {1}]  }
   0x1   :  { %s10_s17 = sshll.u32 %s622_s0, 4  ;;  %s11_s17 = int_to_ptr.vmem [resolvable:$true] %s10_s17 }
   0x2   :  { %s480_s18 = scalar_lea.vmem %s11_s17, 16  ;;  %p485_p1 = scmp.lt.s32.totalorder %s11_s17, %s11_s17 }
   0x3   :  { %p481_p0 = scmp.ne.s32.totalorder %s11_s17, %s480_s18  ;;  %p486_p2 = scmp.lt.s32.totalorder %s480_s18, %s480_s18 }
   0x5   :  { %p487_p3 = por %p486_p2, %p485_p1 }
   0x7   :  { %p488_p4 = pnand %p487_p3, %p481_p0 }
   0x9   :  { %491 = shalt.err (!%p488_p4)  }
   0xa   :  { %s518_s19 = smov [#allocation3]  }
   0xb   :  { %13 = dma.vmem_to_smem %s11_s17, 16, %s518_s19, [#allocation2] }
   0xc   :  { %504 = dma.done.wait [#allocation2], 16 }
   0xd   :  { %505 = vsyncadd [#allocation2], 4294967280 }
   0xe   :  { %15 = sfence }
   0xf   :  { %s548_s20 = smov 0   ;;  %s550_s21 = smov 0  }
  0x10   :  { %s552_s22 = smov 0  }
  0x11 LB: > { %s33_s0 = sadd.s32 1, %s512_s21  ;;  %p436_p5 = scmp.ge.s32.totalorder %s516_s22, 1  ;;  %s516_s22 = sphi %s552_s22, %s21_s22   ;;  %s512_s21 = sphi %s550_s21, %s630_s21   ;;  %s508_s20 = sphi %s548_s20, %s629_s20  }
  0x12   : > { %p35_p6 = scmp.ge.s32.totalorder %s33_s0, 2  ;;  %p177_p7 = scmp.lt.s32.totalorder %s516_s22, 3 }
  0x14   : > { %s632_s0 = smov (%p35_p6, %s33_s0), 0  ;;  %p178_p8 = pnand %p436_p5, %p177_p7 }
  0x15   : > { %p211_p9 = scmp.lt.s32.totalorder (!%p178_p8), %s508_s20, 1  ;;  %s321_s23 = sld [smem:[#allocation3 + %s508_s20]] (!%p178_p8)  ;;  %vm235_vm0 = vcmask (!%p178_p8), 122880   ;;  %vm243_vm1 = vcmask (!%p178_p8), 130048   ;;  %v285_v0 = vlaneseq (!%p178_p8)  ;;  %v519_v1 = vmov (!%p178_p8), 0.0  }
  0x16   : > { %181 = sbr.rel (%p178_p8) target bundleno = 107 (0x6b), region = 28 }
  0x17   : > { %v318_v9 = vand.u32 (!%p178_p8), 127, %v285_v0  ;;  %v286_v24 = vshrl.u32 (!%p178_p8), %v285_v0, 7 }
  0x19   : > { %v287_v31 = vadd.s32 (!%p178_p8), 8, %v286_v24  ;;  %v288_v36 = vadd.s32 (!%p178_p8), 16, %v286_v24  ;;  %v289_v39 = vadd.s32 (!%p178_p8), 24, %v286_v24 }
  0x1b   : > { %v322_v13 = vstv (!%p178_p8), %s321_s23 }
  0x1c   : > { %vm589_vm2 = vcmp.lt.s32.totalorder (!%p178_p8), %v318_v9, %v322_v13 }
  0x1d   : > { %s634_s20 = smov (!%p211_p9, %s508_s20), 1  ;;  %v440_v16 = vsel %vm589_vm2, 1.0, %v519_v1 }
  0x1e   : > { %s443_s24 = sshll.u32 %s634_s20, 5  ;;  %s576_s30 = scalar_lea.vmem %s625_s3, %s634_s20 }
  0x1f   : > { %s218_s27 = scalar_lea.vmem %s623_s1, %s443_s24  ;;  %236 = vst.msk [vmem:[%s576_s30] sm:$0x1] %vm235_vm0, %v519_v1  ;;  %s230_s7 = scalar_lea.vmem %s626_s4, %s634_s20 }
  0x20   : > { %v238_v2 = vld [vmem:[%s218_s27] sm:$0xff]  ;;  %v239_v3 = vld [vmem:[%s218_s27 + $0x8] sm:$0xff]  ;;  %v240_v4 = vld [vmem:[%s218_s27 + $0x10] sm:$0xff]  ;;  %237 = vst.msk [vmem:[%s230_s7] sm:$0x1] %vm235_vm0, %v519_v1  ;;  %s224_s10 = scalar_lea.vmem %s624_s2, %s634_s20 }
  0x21   : > { %v241_v5 = vld [vmem:[%s218_s27 + $0x18] sm:$0xff]  ;;  %v244_v6 = vsel %vm243_vm1, %v238_v2, -inf  ;;  %v245_v7 = vsel %vm243_vm1, %v239_v3, -inf  ;;  %v246_v8 = vsel %vm243_vm1, %v240_v4, -inf  ;;  %v439_v30 = vld [vmem:[%s224_s10] ss:$0 sm:$0xff] }
  0x22   : > { %v247_v10 = vsel %vm243_vm1, %v241_v5, -inf  ;;  %v248_v11 = vmax.f32 %v244_v6, %v245_v7  ;;  %vm294_vm3 = vcmp.eq.s32.totalorder %v286_v24, %v439_v30  ;;  %vm295_vm4 = vcmp.eq.s32.totalorder %v287_v31, %v439_v30 }
  0x23   : > { %v249_v12 = vmax.f32 %v246_v8, %v247_v10  ;;  %v298_v37 = vsel %vm294_vm3, %v238_v2, 0.0  ;;  %v299_v38 = vsel %vm295_vm4, %v239_v3, 0.0  ;;  %vm296_vm5 = vcmp.eq.s32.totalorder %v288_v36, %v439_v30 }
  0x24   : > { %v302_v40 = vsel %vm243_vm1, %v298_v37, 0.0  ;;  %v303_v41 = vsel %vm243_vm1, %v299_v38, 0.0  ;;  %v300_v42 = vsel %vm296_vm5, %v240_v4, 0.0  ;;  %vm297_vm6 = vcmp.eq.s32.totalorder %v289_v39, %v439_v30 }
  0x25   : > { %v250_v14 = vmax.f32 %v248_v11, %v249_v12  ;;  %v304_v44 = vadd.f32 %v303_v41, %v302_v40  ;;  %v305_v47 = vsel %vm243_vm1, %v300_v42, 0.0  ;;  %v301_v50 = vsel %vm297_vm6, %v241_v5, 0.0 }
  0x26   : > { %v307_v57 = vsel %vm243_vm1, %v301_v50, 0.0  ;;  %v324_v12 = vld [vmem:[%s576_s30] sm:$0x1] }
  0x27   : > { %v251_v17 = vrot.slane %v250_v14, 4  ;;  %v329_v18 = vld [vmem:[%s230_s7] sm:$0x1]  ;;  %v306_v55 = vadd.f32 %v305_v47, %v304_v44 }
  0x28   : > { %v332_v20 = vadd.f32 %v440_v16, %v329_v18 }
  0x29   : > { %v252_v19 = vmax.f32 %v250_v14, %v251_v17  ;;  %v308_v59 = vadd.f32 %v307_v57, %v306_v55 }
  0x2a   : > { %333 = vst.msk [vmem:[%s230_s7] sm:$0x1] %vm235_vm0, %v332_v20 }
  0x2b   : > { %v253_v21 = vrot.slane %v252_v19, 2  ;;  %v309_v62 = vrot.slane %v308_v59, 4 }
  0x2d   : > { %v254_v22 = vmax.f32 %v252_v19, %v253_v21  ;;  %v310_v1 = vadd.f32 %v309_v62, %v308_v59 }
  0x2f   : > { %v255_v23 = vrot.slane %v254_v22, 1 }
  0x31   : > { %v256_v25 = vmax.f32 %v254_v22, %v255_v23 }
  0x33   : > { %v257_v26 = vsub.f32 %v238_v2, %v256_v25  ;;  %v258_v27 = vsub.f32 %v239_v3, %v256_v25  ;;  %v259_v28 = vsub.f32 %v240_v4, %v256_v25  ;;  %v260_v29 = vsub.f32 %v241_v5, %v256_v25 }
  0x34   : > { %v311_v4 = vrot.slane %v310_v1, 2 }
  0x35   : > { %v261_v32 = vmul.f32 1.442695, %v257_v26  ;;  %v263_v33 = vmul.f32 1.442695, %v258_v27  ;;  %v265_v34 = vmul.f32 1.442695, %v259_v28 }
  0x36   : > { %v267_v35 = vmul.f32 1.442695, %v260_v29  ;;  %v312_v5 = vadd.f32 %v311_v4, %v310_v1 }
  0x37   : > { %470 = vpow2.f32 %v261_v32 }
  0x38   : > { %472 = vpow2.f32 %v263_v33  ;;  %v313_v6 = vrot.slane %v312_v5, 1 }
  0x39   : > { %474 = vpow2.f32 %v265_v34 }
  0x3a   : > { %476 = vpow2.f32 %v267_v35  ;;  %v314_v9 = vadd.f32 %v313_v6, %v312_v5 }
  0x41   : > { %v471_v43 = vpop.eup %470 }
  0x42   : > { %v473_v45 = vpop.eup %472  ;;  %v269_v46 = vsel %vm243_vm1, %v471_v43, 0.0 }
  0x43   : > { %v475_v48 = vpop.eup %474  ;;  %v270_v49 = vsel %vm243_vm1, %v473_v45, 0.0 }
  0x44   : > { %v477_v51 = vpop.eup %476  ;;  %v271_v52 = vadd.f32 %v270_v49, %v269_v46  ;;  %v272_v53 = vsel %vm243_vm1, %v475_v48, 0.0 }
  0x45   : > { %v274_v54 = vsel %vm243_vm1, %v477_v51, 0.0 }
  0x46   : > { %v273_v56 = vadd.f32 %v272_v53, %v271_v52 }
  0x48   : > { %v275_v58 = vadd.f32 %v274_v54, %v273_v56 }
  0x4a   : > { %v276_v60 = vrot.slane %v275_v58, 4 }
  0x4c   : > { %v277_v61 = vadd.f32 %v276_v60, %v275_v58 }
  0x4e   : > { %v278_v63 = vrot.slane %v277_v61, 2 }
  0x50   : > { %v279_v0 = vadd.f32 %v278_v63, %v277_v61 }
  0x52   : > { %v280_v2 = vrot.slane %v279_v0, 1 }
  0x54   : > { %v281_v3 = vadd.f32 %v280_v2, %v279_v0 }
  0x56   : > { %478 = vlog2.f32 %v281_v3 }
  0x60   : > { %v479_v7 = vpop.eup %478 }
  0x61   : > { %v283_v8 = vmul.f32 0.6931472, %v479_v7 }
  0x63   : > { %v284_v10 = vadd.f32 %v283_v8, %v256_v25 }
  0x65   : > { %v315_v11 = vsub.f32 %v284_v10, %v314_v9 }
  0x67   : > { %v325_v13 = vsel %vm589_vm2, %v315_v11, 0.0 }
  0x68   : > { %v326_v14 = vadd.f32 %v325_v13, %v324_v12 }
  0x6a   : > { %328 = vst.msk [vmem:[%s576_s30] sm:$0x1] %vm235_vm0, %v326_v14 }
  0x6b PF: > { %s21_s22 = sadd.s32 1, %s516_s22   ;;  %s629_s20 = smov %s512_s21 }
  0x6c   : > { %p18_p10 = scmp.ge.s32.totalorder %s21_s22, 4   ;;  %s630_s21 = smov %s632_s0 }
  0x6e   :  { %20 = sbr.rel (!%p18_p10) target bundleno = 17 (0x11), region = 77 }

</bundles_post_ra>
